<compile_context>
chip_gen: v7x
topology: tpu7x:2x2x1
jax: 0.10.0
libtpu: 0.0.40
codegen_flags: <defaults>
</compile_context>

<pallas_src>
import jax
import jax.numpy as jnp
from jax import lax
from jax.experimental import pallas as pl
from jax.experimental.pallas import tpu as pltpu


def _round_up(x, m):
    return ((x + m - 1) // m) * m


def _make_kernel(num_samples, alpha, gamma, ib_eps, tn, half_tiles, has_weight):
    def body(lg_ref, tg_ref, ft_ref, cw_ref, o_ref, acc_ref):
        c = pl.program_id(0)          # TensorCore split (outer, "parallel")
        i = pl.program_id(1)          # sample-tile index within this core
        t = c * half_tiles + i        # global sample-tile index

        @pl.when(i == 0)
        def _():
            acc_ref[...] = jnp.zeros_like(acc_ref)

        logits = lg_ref[...]          # (c_pad, tn) f32; pad rows == -1e30
        tgt = tg_ref[...]             # (1, tn) i32
        feat = ft_ref[...]            # (1, tn) f32
        c_pad = logits.shape[0]

        # ---- logsumexp over class sublanes (pad rows -> exp(-huge) == 0) ----
        m = jnp.max(logits, axis=0, keepdims=True)          # (1, tn)
        e = jnp.exp(logits - m)
        s = jnp.sum(e, axis=0, keepdims=True)
        lse = m + jnp.log(s)                                 # (1, tn)

        # ---- gather logit (and optional class weight) of the target class ---
        sub = lax.broadcasted_iota(jnp.int32, (c_pad, tn), 0)
        onehot = sub == tgt
        logit_t = jnp.sum(jnp.where(onehot, logits, 0.0), axis=0, keepdims=True)

        ce = lse - logit_t            # unweighted CE, (1, tn)
        p_t = jnp.exp(-ce)            # softmax probability of the target class
        one_m_pt = 1.0 - p_t

        # grads identity: sum_c |softmax - onehot| == 2 * (1 - p_target)
        grads = 2.0 * one_m_pt
        # Exact reciprocal on purpose: approx=True (~1e-4 rel err) would eat
        # the validation tolerance and this is one (1, tn) op per tile.
        ib = alpha * pl.reciprocal(grads * feat + ib_eps, approx=False)

        if has_weight:
            cw = cw_ref[...]                                   # (c_pad, 1)
            w_t = jnp.sum(jnp.where(onehot, cw, 0.0), axis=0, keepdims=True)
            ce_w = w_t * ce
        else:
            ce_w = ce

        # ---- focal modulation (gamma is a static Python float) --------------
        if gamma == 0.0:
            loss = ce_w * ib
        else:
            if has_weight:
                one_m_pe = 1.0 - jnp.exp(-ce_w)
            else:
                one_m_pe = one_m_pt   # exp(-ce_w) == p_t when weight is None
            if float(gamma).is_integer() and 0 < gamma <= 4:
                focal = one_m_pe
                for _ in range(int(gamma) - 1):
                    focal = focal * one_m_pe
            else:
                focal = one_m_pe ** gamma
            loss = focal * ce_w * ib

        # ---- accumulate (mask only on tiles that may contain padded lanes) --
        has_pad = (t + 1) * tn > num_samples

        @pl.when(has_pad)
        def _():
            lane = lax.broadcasted_iota(jnp.int32, (1, tn), 1)
            valid = (t * tn + lane) < num_samples
            acc_ref[...] += jnp.where(valid, loss, 0.0)

        @pl.when(jnp.logical_not(has_pad))
        def _():
            acc_ref[...] += loss

        # ---- per-core finalize: reduce lanes, write this core's partial mean -
        @pl.when(i == pl.num_programs(1) - 1)
        def _():
            part = jnp.sum(acc_ref[...], axis=1, keepdims=True) / num_samples
            o_ref[...] = part + jnp.zeros((1, 128), jnp.float32)

    if has_weight:
        def kernel(lg_ref, tg_ref, ft_ref, cw_ref, o_ref, acc_ref):
            body(lg_ref, tg_ref, ft_ref, cw_ref, o_ref, acc_ref)
    else:
        def kernel(lg_ref, tg_ref, ft_ref, o_ref, acc_ref):
            body(lg_ref, tg_ref, ft_ref, None, o_ref, acc_ref)
    return kernel


def ib_focal_loss_tpu(logits, target, features, *, weight=None,
                      alpha=10000.0, gamma=0.0, ib_eps=1e-3,
                      max_tn=32768, class_major_logits=False):
    """logits: (N, C) float (or (C, N) if class_major_logits=True);
    target: (N,) int; features: (N,) or (N, 1) float."""
    assert alpha > 0
    if class_major_logits:
        c, n = logits.shape
    else:
        n, c = logits.shape
    c_pad = max(8, _round_up(c, 8))

    # Adaptive lane tile: big enough to amortize per-step overhead, no bigger
    # than needed for small batches.
    tn = max(128, min(_round_up(max_tn, 128), _round_up(n, 512)))
    n_tiles = _round_up(pl.cdiv(n, tn), 2)      # even -> split over 2 cores
    half_tiles = n_tiles // 2
    n_pad = n_tiles * tn

    # Class-major, class-padded (-1e30 rows), lane-padded logits. The pad value
    # pre-bakes the class mask so the kernel needs no runtime masking.
    # TODO(synk): the (N,C)->(C,N) transpose is one extra HBM pass; callers that
    # already hold class-major logits can pass class_major_logits=True.
    lg_cm = (logits.astype(jnp.float32) if class_major_logits
             else logits.astype(jnp.float32).T)
    lg_t = jnp.full((c_pad, n_pad), -1e30, dtype=jnp.float32)
    lg_t = lg_t.at[:c, :n].set(lg_cm)
    tg = jnp.zeros((1, n_pad), jnp.int32).at[0, :n].set(target.astype(jnp.int32))
    ft = jnp.zeros((1, n_pad), jnp.float32).at[0, :n].set(
        features.reshape(-1).astype(jnp.float32))

    has_weight = weight is not None
    tile_map = lambda cc, ii: (0, cc * half_tiles + ii)
    inputs = [lg_t, tg, ft]
    in_specs = [
        pl.BlockSpec((c_pad, tn), tile_map),    # logits^T tile
        pl.BlockSpec((1, tn), tile_map),        # targets
        pl.BlockSpec((1, tn), tile_map),        # features
    ]
    if has_weight:
        cw = jnp.zeros((c_pad, 1), jnp.float32).at[:c, 0].set(
            jnp.asarray(weight, jnp.float32))
        inputs.append(cw)
        in_specs.append(pl.BlockSpec((c_pad, 1), lambda cc, ii: (0, 0)))

    kernel = _make_kernel(n, float(alpha), float(gamma), float(ib_eps),
                          tn, half_tiles, has_weight)

    out = pl.pallas_call(
        kernel,
        out_shape=jax.ShapeDtypeStruct((1, 2 * 128), jnp.float32),
        grid_spec=pltpu.PrefetchScalarGridSpec(
            num_scalar_prefetch=0,
            grid=(2, half_tiles),
            in_specs=in_specs,
            out_specs=pl.BlockSpec((1, 128), lambda cc, ii: (0, cc)),
            scratch_shapes=[pltpu.VMEM((1, tn), jnp.float32)],  # per-lane acc
        ),
        compiler_params=pltpu.CompilerParams(
            dimension_semantics=("parallel", "arbitrary")),
    )(*inputs)
    # Sum the two per-core partial means.
    return out[0, 0] + out[0, 128]


def _reference(logits, target, features, weight=None, alpha=10000.0,
               gamma=0.0, ib_eps=1e-3):
    """Pure-JAX reference matching the PyTorch forward."""
    logits = logits.astype(jnp.float32)
    c = logits.shape[1]
    p = jax.nn.softmax(logits, axis=1)
    onehot = jax.nn.one_hot(target, c, dtype=jnp.float32)
    grads = jnp.sum(jnp.abs(p - onehot), axis=1)
    ib = grads * features.reshape(-1).astype(jnp.float32)
    ib = alpha / (ib + ib_eps)
    logp = jax.nn.log_softmax(logits, axis=1)
    ce = -jnp.take_along_axis(logp, target[:, None].astype(jnp.int32), axis=1)[:, 0]
    if weight is not None:
        ce = ce * jnp.asarray(weight, jnp.float32)[target]
    pe = jnp.exp(-ce)
    loss = (1.0 - pe) ** gamma * ce * ib
    return jnp.mean(loss)


if __name__ == "__main__":
    key = jax.random.PRNGKey(0)
    k1, k2, k3, k4, k5, k6 = jax.random.split(key, 6)

    # Test 1: module defaults (weight=None, alpha=10000, gamma=0).
    N, C = 37, 10
    logits = jax.random.normal(k1, (N, C), dtype=jnp.float32)
    target = jax.random.randint(k2, (N,), 0, C, dtype=jnp.int32)
    features = jax.random.uniform(k3, (N, 1), dtype=jnp.float32) * 2.0 + 0.1

    out = jax.block_until_ready(ib_focal_loss_tpu(logits, target, features))
    ref = jax.block_until_ready(_reference(logits, target, features))
    assert jnp.allclose(out, ref, rtol=1e-4, atol=1e-5), (out, ref)

    # Test 2: class weights, gamma=2, multiple grid steps per core
    # (small max_tn to exercise accumulation + both masked/unmasked paths).
    N2 = 300
    logits2 = jax.random.normal(k4, (N2, C), dtype=jnp.float32)
    target2 = jax.random.randint(k5, (N2,), 0, C, dtype=jnp.int32)
    features2 = jax.random.uniform(k6, (N2,), dtype=jnp.float32) * 2.0 + 0.1
    w = jnp.linspace(0.5, 1.5, C).astype(jnp.float32)

    out2 = jax.block_until_ready(
        ib_focal_loss_tpu(logits2, target2, features2, weight=w,
                          alpha=100.0, gamma=2.0, max_tn=128))
    ref2 = jax.block_until_ready(
        _reference(logits2, target2, features2, weight=w,
                   alpha=100.0, gamma=2.0))
    assert jnp.allclose(out2, ref2, rtol=1e-4, atol=1e-5), (out2, ref2)

    print("KERNEL_OK")
</pallas_src>

<mosaic_0001>
module attributes {stable_mosaic.version = 11 : i64} {
  func.func @kernel(%arg0: i32, %arg1: i32, %arg2: memref<16x512xf32, #tpu.memory_space<vmem>>, %arg3: memref<1x512xi32, #tpu.memory_space<vmem>>, %arg4: memref<1x512xf32, #tpu.memory_space<vmem>>, %arg5: memref<1x128xf32, #tpu.memory_space<vmem>>, %arg6: memref<1x512xf32, #tpu.memory_space<vmem>>) attributes {dimension_semantics = [#tpu.dimension_semantics<parallel>, #tpu.dimension_semantics<arbitrary>], iteration_bounds = array<i64: 2, 1>, scalar_prefetch = 0 : i64, scratch_operands = 1 : i64, tpu.core_type = #tpu.core_type<tc>, window_params = [{transform_indices = @transform_0, window_bounds = array<i64: 16, 512>}, {transform_indices = @transform_1, window_bounds = array<i64: 1, 512>}, {transform_indices = @transform_2, window_bounds = array<i64: 1, 512>}, {transform_indices = @transform_3, window_bounds = array<i64: 1, 128>}]} {
    %c1_i32 = arith.constant 1 : i32
    %0 = arith.muli %arg0, %c1_i32 : i32
    %1 = arith.addi %0, %arg1 : i32
    %c0_i32 = arith.constant 0 : i32
    %2 = arith.cmpi eq, %arg1, %c0_i32 : i32
    %3 = arith.extui %2 : i1 to i32
    %c0_i32_0 = arith.constant 0 : i32
    %4 = arith.cmpi ne, %3, %c0_i32_0 : i32
    scf.if %4 {
      %cst_19 = arith.constant 0.000000e+00 : f32
      %50 = vector.broadcast %cst_19 : f32 to vector<1x512xf32>
      %c0_20 = arith.constant 0 : index
      %c0_21 = arith.constant 0 : index
      %51 = vector.load %arg6[%c0_20, %c0_21] : memref<1x512xf32, #tpu.memory_space<vmem>>, vector<1x512xf32>
      tpu.vector_store %arg6[%c0_20, %c0_21], %50 {strides = array<i32>} : memref<1x512xf32, #tpu.memory_space<vmem>>, vector<1x512xf32>,
    } else {
    }
    %c0 = arith.constant 0 : index
    %c0_1 = arith.constant 0 : index
    %5 = vector.load %arg2[%c0, %c0_1] : memref<16x512xf32, #tpu.memory_space<vmem>>, vector<16x512xf32>
    %c0_2 = arith.constant 0 : index
    %c0_3 = arith.constant 0 : index
    %6 = vector.load %arg3[%c0_2, %c0_3] : memref<1x512xi32, #tpu.memory_space<vmem>>, vector<1x512xi32>
    %c0_4 = arith.constant 0 : index
    %c0_5 = arith.constant 0 : index
    %7 = vector.load %arg4[%c0_4, %c0_5] : memref<1x512xf32, #tpu.memory_space<vmem>>, vector<1x512xf32>
    %cst = arith.constant dense<0xFF800000> : vector<512xf32>
    %8 = vector.multi_reduction <maximumf>, %5, %cst [0] : vector<16x512xf32> to vector<512xf32>
    %9 = vector.shape_cast %8 : vector<512xf32> to vector<1x512xf32>
    %10 = vector.broadcast %9 : vector<1x512xf32> to vector<16x512xf32>
    %11 = arith.subf %5, %10 : vector<16x512xf32>
    %12 = math.exp %11 : vector<16x512xf32>
    %cst_6 = arith.constant dense<0.000000e+00> : vector<512xf32>
    %13 = vector.multi_reduction <add>, %12, %cst_6 [0] : vector<16x512xf32> to vector<512xf32>
    %14 = vector.shape_cast %13 : vector<512xf32> to vector<1x512xf32>
    %15 = math.log %14 : vector<1x512xf32>
    %16 = arith.addf %9, %15 : vector<1x512xf32>
    %17 = tpu.iota {dimensions = array<i32: 0>} : vector<16x512xi32>
    %18 = vector.broadcast %6 : vector<1x512xi32> to vector<16x512xi32>
    %19 = arith.cmpi eq, %17, %18 : vector<16x512xi32>
    %cst_7 = arith.constant 0.000000e+00 : f32
    %20 = vector.broadcast %cst_7 : f32 to vector<16x512xf32>
    %21 = arith.select %19, %5, %20 : vector<16x512xi1>, vector<16x512xf32>
    %cst_8 = arith.constant dense<0.000000e+00> : vector<512xf32>
    %22 = vector.multi_reduction <add>, %21, %cst_8 [0] : vector<16x512xf32> to vector<512xf32>
    %23 = vector.shape_cast %22 : vector<512xf32> to vector<1x512xf32>
    %24 = arith.subf %16, %23 : vector<1x512xf32>
    %cst_9 = arith.constant 0.000000e+00 : f32
    %25 = vector.broadcast %cst_9 : f32 to vector<1x512xf32>
    %26 = arith.subf %25, %24 : vector<1x512xf32>
    %27 = math.exp %26 : vector<1x512xf32>
    %cst_10 = arith.constant 1.000000e+00 : f32
    %28 = vector.broadcast %cst_10 : f32 to vector<1x512xf32>
    %29 = arith.subf %28, %27 : vector<1x512xf32>
    %cst_11 = arith.constant 2.000000e+00 : f32
    %30 = vector.broadcast %cst_11 : f32 to vector<1x512xf32>
    %31 = arith.mulf %30, %29 : vector<1x512xf32>
    %32 = arith.mulf %31, %7 : vector<1x512xf32>
    %cst_12 = arith.constant 1.000000e-03 : f32
    %33 = vector.broadcast %cst_12 : f32 to vector<1x512xf32>
    %34 = arith.addf %32, %33 : vector<1x512xf32>
    %35 = tpu.reciprocal %34 : vector<1x512xf32> -> vector<1x512xf32>
    %cst_13 = arith.constant 1.000000e+04 : f32
    %36 = vector.broadcast %cst_13 : f32 to vector<1x512xf32>
    %37 = arith.mulf %36, %35 : vector<1x512xf32>
    %38 = arith.mulf %24, %37 : vector<1x512xf32>
    %c1_i32_14 = arith.constant 1 : i32
    %39 = arith.addi %1, %c1_i32_14 : i32
    %c512_i32 = arith.constant 512 : i32
    %40 = arith.muli %39, %c512_i32 : i32
    %c37_i32 = arith.constant 37 : i32
    %41 = arith.cmpi sgt, %40, %c37_i32 : i32
    %42 = arith.extui %41 : i1 to i32
    %c0_i32_15 = arith.constant 0 : i32
    %43 = arith.cmpi ne, %42, %c0_i32_15 : i32
    scf.if %43 {
      %50 = tpu.iota {dimensions = array<i32: 1>} : vector<1x512xi32>
      %c512_i32_19 = arith.constant 512 : i32
      %51 = arith.muli %1, %c512_i32_19 : i32
      %52 = vector.broadcast %51 : i32 to vector<1x512xi32>
      %53 = arith.addi %52, %50 : vector<1x512xi32>
      %c37_i32_20 = arith.constant 37 : i32
      %54 = vector.broadcast %c37_i32_20 : i32 to vector<1x512xi32>
      %55 = arith.cmpi slt, %53, %54 : vector<1x512xi32>
      %c0_21 = arith.constant 0 : index
      %c0_22 = arith.constant 0 : index
      %56 = vector.load %arg6[%c0_21, %c0_22] : memref<1x512xf32, #tpu.memory_space<vmem>>, vector<1x512xf32>
      %cst_23 = arith.constant 0.000000e+00 : f32
      %57 = vector.broadcast %cst_23 : f32 to vector<1x512xf32>
      %58 = arith.select %55, %38, %57 : vector<1x512xi1>, vector<1x512xf32>
      %59 = arith.addf %56, %58 : vector<1x512xf32>
      %c0_24 = arith.constant 0 : index
      %c0_25 = arith.constant 0 : index
      %60 = vector.load %arg6[%c0_24, %c0_25] : memref<1x512xf32, #tpu.memory_space<vmem>>, vector<1x512xf32>
      tpu.vector_store %arg6[%c0_24, %c0_25], %59 {strides = array<i32>} : memref<1x512xf32, #tpu.memory_space<vmem>>, vector<1x512xf32>,
    } else {
    }
    %true = arith.constant true
    %44 = arith.xori %41, %true : i1
    %45 = arith.extui %44 : i1 to i32
    %c0_i32_16 = arith.constant 0 : i32
    %46 = arith.cmpi ne, %45, %c0_i32_16 : i32
    scf.if %46 {
      %c0_19 = arith.constant 0 : index
      %c0_20 = arith.constant 0 : index
      %50 = vector.load %arg6[%c0_19, %c0_20] : memref<1x512xf32, #tpu.memory_space<vmem>>, vector<1x512xf32>
      %51 = arith.addf %50, %38 : vector<1x512xf32>
      %c0_21 = arith.constant 0 : index
      %c0_22 = arith.constant 0 : index
      %52 = vector.load %arg6[%c0_21, %c0_22] : memref<1x512xf32, #tpu.memory_space<vmem>>, vector<1x512xf32>
      tpu.vector_store %arg6[%c0_21, %c0_22], %51 {strides = array<i32>} : memref<1x512xf32, #tpu.memory_space<vmem>>, vector<1x512xf32>,
    } else {
    }
    %c0_i32_17 = arith.constant 0 : i32
    %47 = arith.cmpi eq, %arg1, %c0_i32_17 : i32
    %48 = arith.extui %47 : i1 to i32
    %c0_i32_18 = arith.constant 0 : i32
    %49 = arith.cmpi ne, %48, %c0_i32_18 : i32
    scf.if %49 {
      %c0_19 = arith.constant 0 : index
      %c0_20 = arith.constant 0 : index
      %50 = vector.load %arg6[%c0_19, %c0_20] : memref<1x512xf32, #tpu.memory_space<vmem>>, vector<1x512xf32>
      %cst_21 = arith.constant dense<0.000000e+00> : vector<1xf32>
      %51 = vector.multi_reduction <add>, %50, %cst_21 [1] : vector<1x512xf32> to vector<1xf32>
      %52 = vector.shape_cast %51 : vector<1xf32> to vector<1x1xf32>
      %cst_22 = arith.constant 3.700000e+01 : f32
      %53 = vector.broadcast %cst_22 : f32 to vector<1x1xf32>
      %54 = arith.divf %52, %53 : vector<1x1xf32>
      %cst_23 = arith.constant 0.000000e+00 : f32
      %55 = vector.broadcast %cst_23 : f32 to vector<1x128xf32>
      %56 = vector.broadcast %54 : vector<1x1xf32> to vector<1x128xf32>
      %57 = arith.addf %56, %55 : vector<1x128xf32>
      %c0_24 = arith.constant 0 : index
      %c0_25 = arith.constant 0 : index
      %58 = vector.load %arg5[%c0_24, %c0_25] : memref<1x128xf32, #tpu.memory_space<vmem>>, vector<1x128xf32>
      tpu.vector_store %arg5[%c0_24, %c0_25], %57 {strides = array<i32>} : memref<1x128xf32, #tpu.memory_space<vmem>>, vector<1x128xf32>,
    } else {
    }
    return
  }
  func.func @transform_0(%arg0: i32, %arg1: i32) -> (i32, i32) {
    %c1_i32 = arith.constant 1 : i32
    %0 = arith.muli %arg0, %c1_i32 : i32
    %1 = arith.addi %0, %arg1 : i32
    %c0_i32 = arith.constant 0 : i32
    %c0_i32_0 = arith.constant 0 : i32
    return %c0_i32, %1 : i32, i32
  }
  func.func @transform_1(%arg0: i32, %arg1: i32) -> (i32, i32) {
    %c1_i32 = arith.constant 1 : i32
    %0 = arith.muli %arg0, %c1_i32 : i32
    %1 = arith.addi %0, %arg1 : i32
    %c0_i32 = arith.constant 0 : i32
    %c0_i32_0 = arith.constant 0 : i32
    return %c0_i32, %1 : i32, i32
  }
  func.func @transform_2(%arg0: i32, %arg1: i32) -> (i32, i32) {
    %c1_i32 = arith.constant 1 : i32
    %0 = arith.muli %arg0, %c1_i32 : i32
    %1 = arith.addi %0, %arg1 : i32
    %c0_i32 = arith.constant 0 : i32
    %c0_i32_0 = arith.constant 0 : i32
    return %c0_i32, %1 : i32, i32
  }
  func.func @transform_3(%arg0: i32, %arg1: i32) -> (i32, i32) {
    %c0_i32 = arith.constant 0 : i32
    %c0_i32_0 = arith.constant 0 : i32
    return %c0_i32, %arg0 : i32, i32
  }
}

</mosaic_0001>

<bundles_post_ra>
// kernel: tpu_custom_call.1
= control target key start
LH: loop header
LB: loop body
LE: loop exit
PB: predicated region body
PF: predicated region fallthrough
CT: control target
= control target key end

     0   :  { %s1545_s0 = inlined_call_operand.hbm [shape: f32[16,1024], index: 0, kind: input, shape index: {}]   ;;  %s1546_s1 = inlined_call_operand.hbm [shape: s32[1,1024], index: 1, kind: input, shape index: {}]   ;;  %s1547_s2 = inlined_call_operand.hbm [shape: f32[1,1024], index: 2, kind: input, shape index: {}]   ;;  %s1548_s3 = inlined_call_operand.hbm [shape: f32[1,256], index: 3, kind: output, shape index: {}]  }
   0x1   :  { %1555 = sst [smem:[#allocation16_spill]] %s1545_s0 }
   0x2   :  { %1556 = sst [smem:[#allocation17_spill]] %s1546_s1 }
   0x3   :  { %8 = vsyncpa [#allocation4], 0 }
   0x4   :  { %10 = vsyncpa [#allocation4 + $0x1], 0 }
   0x5   :  { %11 = vsyncpa [#allocation7], 0 }
   0x6   :  { %13 = vsyncpa [#allocation7 + $0x1], 0 }
   0x7   :  { %14 = vsyncpa [#allocation5], 0 }
   0x8   :  { %16 = vsyncpa [#allocation5 + $0x1], 0  ;;  %s1156_s12 = smov 0   ;;  %s1158_s13 = smov 0  }
   0x9   :  { %s1160_s14 = smov 0   ;;  %s1162_s15 = smov 0  }
   0xa   :  { %s1164_s16 = smov 0   ;;  %s1166_s17 = smov 0  }
   0xb LB: > { %1557 = sst [smem:[#allocation13_spill]] %s1120_s16  ;;  %s1187_s18 = sadd.s32 4294967295, %s1124_s17   ;;  %s1124_s17 = sphi %s1166_s17, %s22_s17   ;;  %s1120_s16 = sphi %s1164_s16, %s1580_s16   ;;  %s1116_s15 = sphi %s1162_s15, %s1579_s15   ;;  %s1112_s14 = sphi %s1160_s14, %s1583_s14   ;;  %s1108_s13 = sphi %s1158_s13, %s1582_s13   ;;  %s1104_s12 = sphi %s1156_s12, %s1581_s12  }
   0xc   : > { %s802_s19 = sadd.s32 4294967294, %s1124_s17   ;;  %s34_s20 = sadd.s32 1, %s1120_s16 }
   0xd   : > { %s43_s21 = sadd.s32 1, %s1112_s14  ;;  %p36_p0 = scmp.ge.s32.totalorder %s34_s20, 2 }
   0xe   : > { %p50_p1 = scmp.ne.s32.totalorder %s1112_s14, %s1108_s13  ;;  %p51_p2 = scmp.eq.s32.totalorder %s1124_s17, 0 }
   0xf   : > { %p56_p3 = scmp.ne.s32.totalorder %s1108_s13, %s1104_s12  ;;  %s1585_s20 = smov (%p36_p0, %s34_s20), 0 }
  0x10   : > { %1558 = sst [smem:[#allocation14_spill]] %s1585_s20  ;;  %p1199_p4 = por %p51_p2, %p50_p1 }
  0x11   : > { %p57_p5 = scmp.eq.s32.totalorder %s1187_s18, 0  ;;  %s40_s23 = ssub.s32 %s1120_s16, %s1585_s20 }
  0x12   : > { %p136_p6 = scmp.eq.s32.totalorder %s1187_s18, 1  ;;  %p41_p7 = scmp.eq.s32.totalorder %s40_s23, 0 }
  0x13   : > { %p1207_p8 = por %p57_p5, %p56_p3  ;;  %p142_p10 = scmp.eq.s32.totalorder %s802_s19, 1 }
  0x14   : > { %p1211_p9 = por %p136_p6, %p50_p1  ;;  %p852_p13 = scmp.lt.s32.totalorder %s1124_s17, 2 }
  0x15   : > { %s1560_s24 = scalar_select %p1207_p8, 1, 0 }
  0x16   : > { %s1561_s25 = scalar_select %p1211_p9, 1, 0 }
  0x17   : > { %s1216_s26 = scalar_select %p41_p7, %s1112_s14, %s43_s21  }
  0x18   : > { %p1218_p11 = por %p142_p10, %p56_p3  ;;  %s1225_s28 = sand.u32 1, %s1112_s14  }
  0x19   : > { %1562 = sst [smem:[#allocation15_spill]] %s1216_s26  ;;  %s805_s29 = sshll.u32 %s1225_s28, 6 }
  0x1a   : > { %s1563_s27 = scalar_select %p1218_p11, 1, 0 }
  0x1b   : > { %p1230_p0 = pnand %p852_p13, %p1199_p4  ;;  %s166_s4 = scalar_lea.vmem [#allocation3], %s805_s29 }
  0x1c   : > { %s174_s5 = sshll.u32 %s166_s4, 4  ;;  %s184_s6 = sand.u32 1, %s1124_s17   ;;  %s1235_s5 = int_to_ptr.vmem [resolvable:$true] %s174_s5 }
  0x1d   : > { %s1564_s30 = scalar_select %p1230_p0, 1, 0 }
  0x1e   : > { %s1549_s7 = sshll.u32 %s1225_s28, 2  ;;  %s826_s8 = sshll.u32 %s1120_s16, 6 }
  0x1f   : > { %s1565_s1 = sld [smem:[#allocation17_spill]]  ;;  %s188_s19 = scalar_lea.vmem [#allocation6], %s1549_s7 }
  0x20   : > { %s197_s21 = sshll.u32 %s188_s19, 4  ;;  %s1250_s22 = scalar_lea.sflag [#allocation7], %s184_s6  ;;  %s1248_s21 = int_to_ptr.vmem [resolvable:$true] %s197_s21 }
  0x21   : > { %p1256_p2 = pneg %p1230_p0 }
  0x25   : > { %s1244_s11 = scalar_lea.hbm %s1565_s1, %s826_s8  ;;  %s953_s10 = scalar_lea.hbm %s1565_s1, 128 }
  0x26   : > { %s948_s23 = scalar_lea.hbm %s1244_s11, 64  ;;  %p954_p5 = scmp.lt.u32.totalorder %s1244_s11, %s1565_s1 }
  0x27   : > { %p949_p1 = scmp.ne.s32.totalorder %s1244_s11, %s948_s23  ;;  %p955_p6 = scmp.lt.u32.totalorder %s953_s10, %s948_s23 }
  0x28   : > { %p957_p10 = scmp.lt.u32.totalorder %s948_s23, %s1244_s11 }
  0x29   : > { %p951_p3 = pnand %p1256_p2, %p949_p1  ;;  %p956_p7 = por %p955_p6, %p954_p5 }
  0x2b   : > { %p952_p4 = pneg %p951_p3  ;;  %p958_p13 = por %p957_p10, %p956_p7 }
  0x2d   : > { %p959_p12 = pnand %p958_p13, %p952_p4 }
  0x2f   : > { %962 = shalt.err (!%p959_p12)
}
  0x30   : > { %s963_s6 = scalar_lea.vmem %s1248_s21, 64  ;;  %s1126_s4 = smov [#allocation6]  }
  0x31   : > { %p964_p1 = scmp.ne.s32.totalorder %s1248_s21, %s963_s6  ;;  %s968_s9 = sshll.u32 %s1126_s4, 4  ;;  %s969_s9 = int_to_ptr.vmem [resolvable:$false] %s968_s9 }
  0x32   : > { %s970_s7 = scalar_lea.vmem %s969_s9, 128  ;;  %p971_p9 = scmp.lt.s32.totalorder %s1248_s21, %s969_s9 }
  0x33   : > { %p966_p3 = pnand %p964_p1, %p1256_p2  ;;  %p972_p8 = scmp.lt.s32.totalorder %s970_s7, %s963_s6 }
  0x35   : > { %p967_p11 = pneg %p966_p3  ;;  %p973_p5 = por %p972_p8, %p971_p9 }
  0x37   : > { %p974_p6 = pnand %p973_p5, %p967_p11 }
  0x39   : > { %977 = shalt.err (!%p974_p6)
}
  0x3a   : > { %844 = dma.hbm_to_vmem [thread:$0]  (!%p1230_p0), %s1244_s11, 64, %s1248_s21, %s1250_s22  }
  0x3b   : > { %s1285_s19 = scalar_lea.hbm %s1547_s2, %s826_s8  ;;  %p814_p8 = scmp.ge.s32.totalorder %s1124_s17, 1 }
  0x3c   : > { %p222_p9 = scmp.lt.s32.totalorder %s1124_s17, 3  ;;  %s825_s6 = sshll.u32 %s1120_s16, 9 }
  0x3d   : > { %s1568_s0 = sld [smem:[#allocation16_spill]]  ;;  %s1569_s20 = sshll.u32 %s1225_s28, 2 }
  0x3e   : > { %p1290_p11 = pnand %p814_p8, %p222_p9  ;;  %s1301_s11 = scalar_lea.vmem [#allocation8], %s1569_s20 }
  0x3f   : > { %s217_s8 = sshll.u32 %s1301_s11, 4  ;;  %s163_s21 = scalar_lea.sflag [#allocation4], %s1225_s28  ;;  %s218_s8 = int_to_ptr.vmem [resolvable:$true] %s217_s8 }
  0x40   : > { %s1567_s4 = scalar_select %p1290_p11, 1, 0 }
  0x43   : > { %s1297_s1 = scalar_lea.hbm %s1568_s0, %s825_s6  ;;  %s983_s6 = scalar_lea.hbm %s1568_s0, 2048 }
  0x44   : > { %s978_s23 = scalar_lea.hbm %s1297_s1, 1024  ;;  %p984_p10 = scmp.lt.u32.totalorder %s1297_s1, %s1568_s0 }
  0x45   : > { %p979_p12 = scmp.ne.s32.totalorder %s1297_s1, %s978_s23  ;;  %p985_p13 = scmp.lt.u32.totalorder %s983_s6, %s978_s23 }
  0x46   : > { %p987_p3 = scmp.lt.u32.totalorder %s978_s23, %s1297_s1 }
  0x47   : > { %p981_p4 = pnand %p979_p12, %p1256_p2  ;;  %p986_p1 = por %p985_p13, %p984_p10 }
  0x49   : > { %p982_p7 = pneg %p981_p4  ;;  %p988_p5 = por %p987_p3, %p986_p1 }
  0x4b   : > { %p989_p6 = pnand %p988_p5, %p982_p7 }
  0x4d   : > { %992 = shalt.err (!%p989_p6)
}
  0x4e   : > { %s993_s20 = scalar_lea.vmem %s1235_s5, 1024  ;;  %s1127_s16 = smov [#allocation3]  }
  0x4f   : > { %p994_p8 = scmp.ne.s32.totalorder %s1235_s5, %s993_s20  ;;  %s998_s10 = sshll.u32 %s1127_s16, 4  ;;  %s999_s10 = int_to_ptr.vmem [resolvable:$false] %s998_s10 }
  0x50   : > { %s1000_s9 = scalar_lea.vmem %s999_s10, 2048  ;;  %p1001_p4 = scmp.lt.s32.totalorder %s1235_s5, %s999_s10 }
  0x51   : > { %p996_p9 = pnand %p994_p8, %p1256_p2  ;;  %p1002_p11 = scmp.lt.s32.totalorder %s1000_s9, %s993_s20 }
  0x53   : > { %p997_p12 = pneg %p996_p9  ;;  %p1003_p10 = por %p1002_p11, %p1001_p4 }
  0x55   : > { %p1004_p13 = pnand %p1003_p10, %p997_p12 }
  0x57   : > { %1007 = shalt.err (!%p1004_p13)
}
  0x58   : > { %s1128_s23 = smov 1024   ;;  %s1129_s6 = smov 512  }
  0x59   : > { %s1130_s7 = smov 32   ;;  %s1008_s20 = scalar_lea.hbm %s1285_s19, 64 }
  0x5a   : > { %841 = dma.hbm_to_vmem [thread:$0]  (!%p1230_p0), %s1297_s1, 1024, %s1235_s5, %s163_s21, %s1128_s23, %s1129_s6, %s1130_s7  }
  0x5b   : > { %p1009_p11 = scmp.ne.s32.totalorder %s1285_s19, %s1008_s20  ;;  %s1013_s9 = scalar_lea.hbm %s1547_s2, 128 }
  0x5c   : > { %p1014_p3 = scmp.lt.u32.totalorder %s1285_s19, %s1547_s2  ;;  %p1015_p5 = scmp.lt.u32.totalorder %s1013_s9, %s1008_s20 }
  0x5d   : > { %p1011_p7 = pnand %p1009_p11, %p1256_p2  ;;  %p1017_p8 = scmp.lt.u32.totalorder %s1008_s20, %s1285_s19 }
  0x5e   : > { %p1016_p6 = por %p1015_p5, %p1014_p3 }
  0x5f   : > { %p1012_p1 = pneg %p1011_p7 }
  0x60   : > { %p1018_p9 = por %p1017_p8, %p1016_p6 }
  0x62   : > { %p1019_p12 = pnand %p1018_p9, %p1012_p1 }
  0x64   : > { %1022 = shalt.err (!%p1019_p12)
}
  0x65   : > { %s1023_s1 = scalar_lea.vmem %s218_s8, 64  ;;  %s1131_s28 = smov [#allocation8]  }
  0x66   : > { %p1024_p4 = scmp.ne.s32.totalorder %s218_s8, %s1023_s1  ;;  %s1028_s5 = sshll.u32 %s1131_s28, 4  ;;  %s1029_s5 = int_to_ptr.vmem [resolvable:$false] %s1028_s5 }
  0x67   : > { %s1030_s11 = scalar_lea.vmem %s1029_s5, 128  ;;  %p1031_p11 = scmp.lt.s32.totalorder %s218_s8, %s1029_s5 }
  0x68   : > { %p1026_p10 = pnand %p1024_p4, %p1256_p2  ;;  %p1032_p7 = scmp.lt.s32.totalorder %s1030_s11, %s1023_s1 }
  0x6a   : > { %p1027_p13 = pneg %p1026_p10  ;;  %p1033_p0 = por %p1032_p7, %p1031_p11 }
  0x6c   : > { %p1034_p3 = pnand %p1033_p0, %p1027_p13 }
  0x6e   : > { %1037 = shalt.err (!%p1034_p3)
}
  0x6f   : > { %p1570_p5 = scmp.ne.s32.totalorder %s1564_s30, 0  ;;  %p1571_p1 = scmp.ne.s32.totalorder %s1567_s4, 0 }
  0x70   : > { %s1351_s0 = sand.u32 (!%p1571_p1), 1, %s1108_s13   ;;  %p1572_p2 = scmp.ne.s32.totalorder (!%p1571_p1), %s1560_s24, 0 }
  0x71   : > { %847 = dma.hbm_to_vmem [thread:$0]  (!%p1570_p5), %s1285_s19, 64, %s218_s8, %s1250_s22  }
  0x72   : > { %226 = sbr.rel (%p1571_p1) target bundleno = 435 (0x1b3), region = 32  ;;  %s815_s26 = sshll.u32 (!%p1571_p1), %s1351_s0, 6 }
  0x73   : > { %s229_s29 = scalar_lea.sflag (!%p1571_p1), [#allocation4], %s1351_s0  ;;  %s232_s21 = scalar_lea.vmem (!%p1571_p1), [#allocation3], %s815_s26 }
  0x79   : > { %1091 = dma.done.wait (%p1572_p2), %s229_s29, 1024  }
  0x7a   : > { %1093 = vsyncadd (%p1572_p2), %s229_s29, 4294966272  ;;  %s237_s30 = sand.u32 1, %s1187_s18   ;;  %s816_s22 = sshll.u32 %s1351_s0, 2 }
  0x7b   : > { %s238_s19 = scalar_lea.sflag [#allocation7], %s237_s30  ;;  %s1363_s4 = scalar_lea.vmem [#allocation6], %s816_s22 }
  0x7c   : > { %1095 = dma.done.wait (%p1572_p2), %s238_s19, 128  }
  0x7d   : > { %1097 = vsyncadd (%p1572_p2), %s238_s19, 4294967168  ;;  %v293_v0 = vlaneseq  ;;  %s828_s8 = sshll.u32 %s1116_s15, 9  ;;  %v1132_v2 = vmov 0.0   ;;  %v1381_v3 = vld [vmem:[%s232_s21] sm:$0xff]  ;;  %v1383_v4 = vld [vmem:[%s232_s21 + $0x8] sm:$0xff]  ;;  %s250_s24 = scalar_lea.vmem [#allocation8], %s816_s22 }
  0x7e   : > { %s1377_s18 = sadd.s32 512, %s828_s8  ;;  %v1385_v5 = vld [vmem:[%s232_s21 + $0x10] sm:$0xff]  ;;  %v1387_v6 = vld [vmem:[%s232_s21 + $0x18] sm:$0xff]  ;;  %v1389_v7 = vld [vmem:[%s232_s21 + $0x20] sm:$0xff]  ;;  %s281_s23 = scalar_lea.vmem [#allocation9], %s1351_s0 }
  0x7f   : > { %vm1371_vm0 = vcmp.lt.s32.totalorder %v293_v0, 512  ;;  %v1391_v8 = vld [vmem:[%s232_s21 + $0x28] sm:$0xff]  ;;  %v1393_v9 = vld [vmem:[%s232_s21 + $0x30] sm:$0xff]  ;;  %v1395_v10 = vld [vmem:[%s232_s21 + $0x38] sm:$0xff]  ;;  %v308_v11 = vmax.f32 %v1381_v3, %v1389_v7  ;;  %v1428_v48 = vshrl.u32 %v293_v0, 7  ;;  %p819_p0 = scmp.le.s32.totalorder %s1377_s18, 37 }
  0x80   : > { %297 = vst.msk [vmem:[#allocation2] sm:$0xf] %vm1371_vm0, %v1132_v2  ;;  %v315_v12 = vmax.f32 %v1383_v4, %v1391_v8  ;;  %v322_v13 = vmax.f32 %v1385_v5, %v1393_v9  ;;  %v329_v14 = vmax.f32 %v1387_v6, %v1395_v10  ;;  %v306_v56 = vld [vmem:[%s1363_s4] sm:$0xf] }
  0x81   : > { %v309_v15 = vrot.slane %v308_v11, 4  ;;  %v1433_v55 = vsub.s32 0, %v1428_v48  ;;  %v1437_v58 = vsub.s32 1, %v1428_v48  ;;  %v1440_v59 = vsub.s32 2, %v1428_v48 }
  0x82   : > { %v316_v16 = vrot.slane %v315_v12, 4  ;;  %v323_v17 = vrot.slane %v322_v13, 4  ;;  %v330_v18 = vrot.slane %v329_v14, 4  ;;  %v1443_v60 = vsub.s32 3, %v1428_v48 }
  0x83   : > { %v310_v19 = vmax.f32 %v308_v11, %v309_v15  ;;  %v402_v61 = vadd.s32 8, %v1428_v48  ;;  %v406_v62 = vrot.slane %v306_v56, %v1433_v55  ;;  %v410_v63 = vrot.slane %v306_v56, %v1437_v58 }
  0x84   : > { %v317_v20 = vmax.f32 %v315_v12, %v316_v16  ;;  %v324_v21 = vmax.f32 %v322_v13, %v323_v17  ;;  %v331_v22 = vmax.f32 %v329_v14, %v330_v18  ;;  %v414_v2 = vrot.slane %v306_v56, %v1440_v59 }
  0x85   : > { %v311_v23 = vrot.slane %v310_v19, 2  ;;  %v418_v11 = vrot.slane %v306_v56, %v1443_v60  ;;  %vm419_vm1 = vcmp.eq.s32.totalorder %v1428_v48, %v406_v62  ;;  %vm423_vm2 = vcmp.eq.s32.totalorder %v402_v61, %v406_v62 }
  0x86   : > { %v318_v24 = vrot.slane %v317_v20, 2  ;;  %v325_v25 = vrot.slane %v324_v21, 2  ;;  %v332_v26 = vrot.slane %v331_v22, 2  ;;  %vm420_vm3 = vcmp.eq.s32.totalorder %v1428_v48, %v410_v63 }
  0x87   : > { %v312_v27 = vmax.f32 %v310_v19, %v311_v23  ;;  %vm424_vm4 = vcmp.eq.s32.totalorder %v402_v61, %v410_v63  ;;  %vm421_vm5 = vcmp.eq.s32.totalorder %v1428_v48, %v414_v2  ;;  %vm425_vm6 = vcmp.eq.s32.totalorder %v402_v61, %v414_v2 }
  0x88   : > { %v319_v28 = vmax.f32 %v317_v20, %v318_v24  ;;  %v326_v29 = vmax.f32 %v324_v21, %v325_v25  ;;  %v333_v30 = vmax.f32 %v331_v22, %v332_v26  ;;  %vm422_vm7 = vcmp.eq.s32.totalorder %v1428_v48, %v418_v11 }
  0x89   : > { %v313_v31 = vrot.slane %v312_v27, 1  ;;  %vm426_vm8 = vcmp.eq.s32.totalorder %v402_v61, %v418_v11  ;;  %v427_v16 = vsel %vm419_vm1, %v1381_v3, 0.0  ;;  %v431_v17 = vsel %vm423_vm2, %v1389_v7, 0.0 }
  0x8a   : > { %v320_v32 = vrot.slane %v319_v28, 1  ;;  %v327_v33 = vrot.slane %v326_v29, 1  ;;  %v334_v34 = vrot.slane %v333_v30, 1  ;;  %v428_v19 = vsel %vm420_vm3, %v1383_v4, 0.0 }
  0x8b   : > { %v1405_v35 = vmax.f32 %v312_v27, %v313_v31  ;;  %v432_v20 = vsel %vm424_vm4, %v1391_v8, 0.0  ;;  %v429_v23 = vsel %vm421_vm5, %v1385_v5, 0.0  ;;  %v433_v24 = vsel %vm425_vm6, %v1393_v9, 0.0 }
  0x8c   : > { %v1407_v36 = vmax.f32 %v319_v28, %v320_v32  ;;  %v1409_v37 = vmax.f32 %v326_v29, %v327_v33  ;;  %v1411_v38 = vmax.f32 %v333_v30, %v334_v34  ;;  %v430_v27 = vsel %vm422_vm7, %v1387_v6, 0.0 }
  0x8d   : > { %v336_v39 = vsub.f32 %v1381_v3, %v1405_v35  ;;  %v340_v41 = vsub.f32 %v1389_v7, %v1405_v35  ;;  %v434_v28 = vsel %vm426_vm8, %v1395_v10, 0.0  ;;  %v435_v3 = vadd.f32 %v431_v17, %v427_v16 }
  0x8e   : > { %v337_v40 = vsub.f32 %v1383_v4, %v1407_v36  ;;  %v338_v42 = vsub.f32 %v1385_v5, %v1409_v37  ;;  %v339_v43 = vsub.f32 %v1387_v6, %v1411_v38  ;;  %v341_v44 = vsub.f32 %v1391_v8, %v1407_v36 }
  0x8f   : > { %v342_v45 = vsub.f32 %v1393_v9, %v1409_v37  ;;  %v344_v46 = vmul.f32 1.442695, %v336_v39  ;;  %v343_v49 = vsub.f32 %v1395_v10, %v1411_v38  ;;  %v352_v52 = vmul.f32 1.442695, %v340_v41 }
  0x90   : > { %v346_v47 = vmul.f32 1.442695, %v337_v40  ;;  %v348_v50 = vmul.f32 1.442695, %v338_v42  ;;  %v350_v51 = vmul.f32 1.442695, %v339_v43  ;;  %v442_v31 = vadd.f32 %v432_v20, %v428_v19 }
  0x91   : > { %908 = vpow2.f32 %v344_v46  ;;  %v354_v53 = vmul.f32 1.442695, %v341_v44  ;;  %v356_v54 = vmul.f32 1.442695, %v342_v45  ;;  %v358_v57 = vmul.f32 1.442695, %v343_v49 }
  0x92   : > { %910 = vpow2.f32 %v346_v47  ;;  %v449_v8 = vadd.f32 %v433_v24, %v429_v23  ;;  %v456_v39 = vadd.f32 %v434_v28, %v430_v27  ;;  %v436_v9 = vrot.slane %v435_v3, 4 }
  0x93   : > { %912 = vpow2.f32 %v348_v50  ;;  %v443_v43 = vrot.slane %v442_v31, 4 }
  0x94   : > { %914 = vpow2.f32 %v350_v51  ;;  %v450_v10 = vrot.slane %v449_v8, 4  ;;  %v457_v47 = vrot.slane %v456_v39, 4  ;;  %v437_v51 = vadd.f32 %v436_v9, %v435_v3 }
  0x95   : > { %916 = vpow2.f32 %v352_v52 }
  0x96   : > { %918 = vpow2.f32 %v354_v53  ;;  %v451_v61 = vadd.f32 %v450_v10, %v449_v8  ;;  %v458_v2 = vadd.f32 %v457_v47, %v456_v39 }
  0x97   : > { %920 = vpow2.f32 %v356_v54  ;;  %v444_v54 = vadd.f32 %v443_v43, %v442_v31 }
  0x98   : > { %922 = vpow2.f32 %v358_v57  ;;  %v452_v17 = vrot.slane %v451_v61, 2 }
  0x9b   : > { %v909_v12 = vpop.eup %908 }
  0x9c   : > { %v911_v13 = vpop.eup %910 }
  0x9d   : > { %v913_v14 = vpop.eup %912 }
  0x9e   : > { %v915_v15 = vpop.eup %914 }
  0x9f   : > { %v917_v18 = vpop.eup %916 }
  0xa0   : > { %v919_v21 = vpop.eup %918  ;;  %v360_v22 = vadd.f32 %v917_v18, %v909_v12  ;;  %v459_v18 = vrot.slane %v458_v2, 2 }
  0xa1   : > { %v921_v25 = vpop.eup %920  ;;  %v367_v26 = vadd.f32 %v919_v21, %v911_v13  ;;  %v438_v13 = vrot.slane %v437_v51, 2  ;;  %v453_v21 = vadd.f32 %v452_v17, %v451_v61 }
  0xa2   : > { %v923_v29 = vpop.eup %922  ;;  %v361_v7 = vrot.slane %v360_v22, 4  ;;  %v374_v30 = vadd.f32 %v921_v25, %v913_v14 }
  0xa3   : > { %v368_v4 = vrot.slane %v367_v26, 4  ;;  %v381_v32 = vadd.f32 %v923_v29, %v915_v15  ;;  %v445_v15 = vrot.slane %v444_v54, 2  ;;  %v439_v19 = vadd.f32 %v438_v13, %v437_v51 }
  0xa4   : > { %v362_v33 = vadd.f32 %v361_v7, %v360_v22  ;;  %v375_v34 = vrot.slane %v374_v30, 4  ;;  %v460_v22 = vadd.f32 %v459_v18, %v458_v2  ;;  %v454_v25 = vrot.slane %v453_v21, 1 }
  0xa5   : > { %v369_v5 = vadd.f32 %v368_v4, %v367_v26  ;;  %v382_v40 = vrot.slane %v381_v32, 4  ;;  %v446_v20 = vadd.f32 %v445_v15, %v444_v54  ;;  %v440_v23 = vrot.slane %v439_v19, 1 }
  0xa6   : > { %v363_v41 = vrot.slane %v362_v33, 2  ;;  %v376_v42 = vadd.f32 %v375_v34, %v374_v30  ;;  %v461_v27 = vrot.slane %v460_v22, 1 }
  0xa7   : > { %v370_v6 = vrot.slane %v369_v5, 2  ;;  %v383_v44 = vadd.f32 %v382_v40, %v381_v32  ;;  %v447_v24 = vrot.slane %v446_v20, 1  ;;  %v441_v29 = vadd.f32 %v440_v23, %v439_v19 }
  0xa8   : > { %v364_v45 = vadd.f32 %v363_v41, %v362_v33  ;;  %v377_v46 = vrot.slane %v376_v42, 2  ;;  %v455_v33 = vadd.f32 %v454_v25, %v453_v21 }
  0xa9   : > { %v371_v49 = vadd.f32 %v370_v6, %v369_v5  ;;  %v384_v50 = vrot.slane %v383_v44, 2  ;;  %v448_v31 = vadd.f32 %v447_v24, %v446_v20  ;;  %v462_v5 = vadd.f32 %v461_v27, %v460_v22 }
  0xaa   : > { %v365_v52 = vrot.slane %v364_v45, 1  ;;  %v378_v53 = vadd.f32 %v377_v46, %v376_v42 }
  0xab   : > { %v372_v56 = vrot.slane %v371_v49, 1  ;;  %v385_v57 = vadd.f32 %v384_v50, %v383_v44 }
  0xac   : > { %v366_v62 = vadd.f32 %v365_v52, %v364_v45  ;;  %v379_v63 = vrot.slane %v378_v53, 1 }
  0xad   : > { %v373_v11 = vadd.f32 %v372_v56, %v371_v49  ;;  %v386_v12 = vrot.slane %v385_v57, 1 }
  0xae   : > { %v380_v14 = vadd.f32 %v379_v63, %v378_v53  ;;  %924 = vlog2.f32 %v366_v62 }
  0xaf   : > { %v387_v16 = vadd.f32 %v386_v12, %v385_v57  ;;  %926 = vlog2.f32 %v373_v11 }
  0xb0   : > { %928 = vlog2.f32 %v380_v14 }
  0xb1   : > { %930 = vlog2.f32 %v387_v16 }
  0xb8   : > { %v925_v26 = vpop.eup %924 }
  0xb9   : > { %v927_v28 = vpop.eup %926  ;;  %v389_v3 = vmul.f32 0.6931472, %v925_v26 }
  0xba   : > { %v929_v7 = vpop.eup %928  ;;  %v391_v30 = vmul.f32 0.6931472, %v927_v28 }
  0xbb   : > { %v931_v4 = vpop.eup %930  ;;  %v393_v32 = vmul.f32 0.6931472, %v929_v7  ;;  %v396_v8 = vadd.f32 %v389_v3, %v1405_v35 }
  0xbc   : > { %v395_v34 = vmul.f32 0.6931472, %v931_v4  ;;  %v397_v39 = vadd.f32 %v391_v30, %v1407_v36 }
  0xbd   : > { %v398_v40 = vadd.f32 %v393_v32, %v1409_v37  ;;  %v463_v9 = vsub.f32 %v396_v8, %v441_v29  ;;  %v307_v37 = vld [vmem:[%s250_s24] sm:$0xf]  ;;  %v535_v32 = vand.u32 (!%p819_p0), 127, %v293_v0  ;;  %v540_v8 = vstv (!%p819_p0), %s828_s8 }
  0xbe   : > { %v399_v41 = vadd.f32 %v395_v34, %v1411_v38  ;;  %v464_v42 = vsub.f32 %v397_v39, %v448_v31  ;;  %v491_v52 = vrot.slane %v307_v37, %v1433_v55  ;;  %v495_v56 = vrot.slane %v307_v37, %v1437_v58 }
  0xbf   : > { %v465_v43 = vsub.f32 %v398_v40, %v455_v33  ;;  %v467_v6 = vsub.f32 0.0, %v463_v9  ;;  %v499_v63 = vrot.slane %v307_v37, %v1440_v59  ;;  %v503_v12 = vrot.slane %v307_v37, %v1443_v60 }
  0xc0   : > { %v466_v44 = vsub.f32 %v399_v41, %v462_v5  ;;  %v468_v10 = vsub.f32 0.0, %v464_v42  ;;  %v1133_v33 = vmov (!%p819_p0), 1966171168   ;;  %v536_v39 = vadd.s32 (!%p819_p0), 128, %v535_v32 }
  0xc1   : > { %v469_v45 = vsub.f32 0.0, %v465_v43  ;;  %v471_v46 = vmul.f32 1.442695, %v467_v6  ;;  %v561_v34 = vunpack.c.l.s4 (!%p819_p0), %v1133_v33  ;;  %v537_v5 = vadd.s32 (!%p819_p0), 256, %v535_v32 }
  0xc2   : > { %v470_v47 = vsub.f32 0.0, %v466_v44  ;;  %v473_v35 = vmul.f32 1.442695, %v468_v10  ;;  %v538_v40 = vadd.s32 (!%p819_p0), 384, %v535_v32  ;;  %v541_v41 = vadd.s32 (!%p819_p0), %v540_v8, %v535_v32 }
  0xc3   : > { %932 = vpow2.f32 %v471_v46  ;;  %v475_v49 = vmul.f32 1.442695, %v469_v45  ;;  %v542_v6 = vadd.s32 (!%p819_p0), %v540_v8, %v536_v39 }
  0xc4   : > { %934 = vpow2.f32 %v473_v35  ;;  %v477_v36 = vmul.f32 1.442695, %v470_v47  ;;  %vm545_vm9 = vcmp.lt.s32.totalorder (!%p819_p0), %v541_v41, 37 }
  0xc5   : > { %936 = vpow2.f32 %v475_v49  ;;  %vm546_vm10 = vcmp.lt.s32.totalorder (!%p819_p0), %v542_v6, 37 }
  0xc6   : > { %938 = vpow2.f32 %v477_v36 }
  0xcd   : > { %v933_v38 = vpop.eup %932 }
  0xce   : > { %v935_v50 = vpop.eup %934  ;;  %v479_v51 = vsub.f32 1.0, %v933_v38  ;;  %v549_v38 = vld [vmem:[#allocation2] sm:$0xf] (!%p819_p0) }
  0xcf   : > { %v937_v53 = vpop.eup %936  ;;  %v480_v54 = vsub.f32 1.0, %v935_v50 }
  0xd0   : > { %v939_v57 = vpop.eup %938  ;;  %v481_v61 = vsub.f32 1.0, %v937_v53  ;;  %v483_v62 = vmul.f32 2.0, %v479_v51 }
  0xd1   : > { %v482_v2 = vsub.f32 1.0, %v939_v57  ;;  %v484_v11 = vmul.f32 2.0, %v480_v54 }
  0xd2   : > { %v485_v13 = vmul.f32 2.0, %v481_v61  ;;  %v508_v14 = vmul.f32 %v491_v52, %v483_v62 }
  0xd3   : > { %v486_v15 = vmul.f32 2.0, %v482_v2  ;;  %v509_v16 = vmul.f32 %v495_v56, %v484_v11 }
  0xd4   : > { %v510_v17 = vmul.f32 %v499_v63, %v485_v13  ;;  %v512_v18 = vadd.f32 0.001, %v508_v14 }
  0xd5   : > { %v511_v19 = vmul.f32 %v503_v12, %v486_v15  ;;  %v513_v20 = vadd.f32 0.001, %v509_v16 }
  0xd6   : > { %v514_v21 = vadd.f32 0.001, %v510_v17  ;;  %940 = vrcp.f32 %v512_v18 }
  0xd7   : > { %v515_v22 = vadd.f32 0.001, %v511_v19  ;;  %942 = vrcp.f32 %v513_v20 }
  0xd8   : > { %944 = vrcp.f32 %v514_v21 }
  0xd9   : > { %946 = vrcp.f32 %v515_v22 }
  0xe0   : > { %v941_v23 = vpop.eup %940  ;;  %533 = sbr.rel (%p819_p0) target bundleno = 244 (0xf4), region = 52 }
  0xe1   : > { %v943_v24 = vpop.eup %942  ;;  %v520_v25 = vmul.f32 10000.0, %v941_v23 }
  0xe2   : > { %v945_v26 = vpop.eup %944  ;;  %v521_v27 = vmul.f32 10000.0, %v943_v24 }
  0xe3   : > { %v947_v28 = vpop.eup %946  ;;  %v522_v3 = vmul.f32 10000.0, %v945_v26  ;;  %v524_v29 = vmul.f32 %v520_v25, %v463_v9  ;;  %v562_v9 = vunpack.c.0.s8 (!%p819_p0), %v561_v34 }
  0xe4   : > { %v523_v7 = vmul.f32 10000.0, %v947_v28  ;;  %v525_v30 = vmul.f32 %v521_v27, %v464_v42  ;;  %v543_v42 = vadd.s32 (!%p819_p0), %v540_v8, %v537_v5 }
  0xe5   : > { %v526_v31 = vmul.f32 %v522_v3, %v465_v43  ;;  %v544_v43 = vadd.s32 (!%p819_p0), %v540_v8, %v538_v40  ;;  %v565_v10 = vsub.s32 (!%p819_p0), %v562_v9, %v1428_v48 }
  0xe6   : > { %v527_v4 = vmul.f32 %v523_v7, %v466_v44  ;;  %v550_v44 = vsel (!%p819_p0), %vm545_vm9, %v524_v29, 0.0  ;;  %vm547_vm11 = vcmp.lt.s32.totalorder (!%p819_p0), %v543_v42, 37  ;;  %v551_v0 = vsel (!%p819_p0), %vm546_vm10, %v525_v30, 0.0 }
  0xe7   : > { %vm548_vm12 = vcmp.lt.s32.totalorder %v544_v43, 37  ;;  %v552_v45 = vsel %vm547_vm11, %v526_v31, 0.0  ;;  %v558_v47 = vcombine.low %v550_v44, %v551_v0 }
  0xe8   : > { %v553_v46 = vsel %vm548_vm12, %v527_v4, 0.0 }
  0xe9   : > { %v559_v35 = vcombine.low %v552_v45, %v553_v46  ;;  %v566_v49 = vrot.slane %v558_v47, %v565_v10 }
  0xeb   : > { %v573_v36 = vrot.slane %v559_v35, %v565_v10 }
  0xed   : > { %v574_v37 = vcombine.low %v566_v49, %v573_v36 }
  0xef   : > { %v581_v50 = vrot.slane %v574_v37, %v565_v10 }
  0xf1   : > { %v583_v51 = vadd.f32 %v581_v50, %v549_v38 }
  0xf3   : > { %588 = vst.msk [vmem:[#allocation2] sm:$0xf] %vm1371_vm0, %v583_v51 }
  0xf4 PF: > { %p821_p6 = scmp.gt.s32.totalorder %s1377_s18, 37 }
  0xf5   : > { %v1134_v52 = vmov (!%p821_p6), 1966171168   ;;  %v598_v54 = vcombine.low (!%p821_p6), %v524_v29, %v525_v30  ;;  %v599_v56 = vcombine.low (!%p821_p6), %v526_v31, %v527_v4 }
  0xf6   : > { %592 = sbr.rel (%p821_p6) target bundleno = 261 (0x105), region = 56  ;;  %v601_v53 = vunpack.c.l.s4 (!%p821_p6), %v1134_v52 }
  0xf8   : > { %v602_v57 = vunpack.c.0.s8 (!%p821_p6), %v601_v53 }
  0xfa   : > { %v605_v61 = vsub.s32 (!%p821_p6), %v602_v57, %v1428_v48  ;;  %v593_v11 = vld [vmem:[#allocation2] sm:$0xf] (!%p821_p6) }
  0xfc   : > { %v606_v62 = vrot.slane (!%p821_p6), %v598_v54, %v605_v61  ;;  %v613_v63 = vrot.slane (!%p821_p6), %v599_v56, %v605_v61 }
  0xfe   : > { %v614_v2 = vcombine.low %v606_v62, %v613_v63 }
 0x100   : > { %v621_v12 = vrot.slane %v614_v2, %v605_v61 }
 0x102   : > { %v623_v13 = vadd.f32 %v621_v12, %v593_v11 }
 0x104   : > { %628 = vst.msk [vmem:[#allocation2] sm:$0xf] %vm1371_vm0, %v623_v13 }
 0x105 PF: > { %vm654_vm13 = vcmask 1040384   ;;  %s822_s6 = sshll.u32 %s1116_s15, 4  ;;  %s681_s7 = sshll.u32 %s281_s23, 4  ;;  %s1496_s7 = int_to_ptr.vmem [resolvable:$true] %s681_s7 }
 0x106   : > { %s1494_s10 = scalar_lea.hbm %s1548_s3, %s822_s6  ;;  %s669_s9 = scalar_lea.sflag [#allocation5], %s1351_s0 }
 0x107   : > { %s1038_s1 = scalar_lea.vmem %s1496_s7, 16  ;;  %p1575_p9 = scmp.ne.s32.totalorder %s1561_s25, 0 }
 0x108   : > { %p1039_p8 = scmp.ne.s32.totalorder %s1496_s7, %s1038_s1  ;;  %s1135_s15 = smov [#allocation9]  }
 0x109   : > { %s1042_s28 = sshll.u32 %s1135_s15, 4  ;;  %s1043_s28 = int_to_ptr.vmem [resolvable:$false] %s1042_s28 }
 0x10a   : > { %p1040_p12 = pnand %p1039_p8, %p1575_p9  ;;  %s1044_s5 = scalar_lea.vmem %s1043_s28, 32 }
 0x10b   : > { %v632_v14 = vld [vmem:[#allocation2] sm:$0xf]  ;;  %p1045_p10 = scmp.lt.s32.totalorder %s1496_s7, %s1043_s28  ;;  %p1046_p13 = scmp.lt.s32.totalorder %s1044_s5, %s1038_s1 }
 0x10c   : > { %v637_v15 = vrot.slane %v632_v14, %v1433_v55  ;;  %v641_v16 = vrot.slane %v632_v14, %v1437_v58  ;;  %v645_v48 = vrot.slane %v632_v14, %v1440_v59  ;;  %v649_v17 = vrot.slane %v632_v14, %v1443_v60  ;;  %p1041_p4 = pneg %p1040_p12 }
 0x10d   : > { %p1047_p11 = por %p1046_p13, %p1045_p10 }
 0x10e   : > { %v655_v18 = vsel %vm654_vm13, %v637_v15, 0.0  ;;  %v656_v19 = vsel %vm654_vm13, %v641_v16, 0.0  ;;  %v658_v20 = vsel %vm654_vm13, %v645_v48, 0.0  ;;  %v660_v21 = vsel %vm654_vm13, %v649_v17, 0.0 }
 0x10f   : > { %v657_v1 = vadd.f32 %v656_v19, %v655_v18  ;;  %p1048_p7 = pnand %p1047_p11, %p1041_p4 }
 0x111   : > { %v659_v22 = vadd.f32 %v658_v20, %v657_v1 }
 0x113   : > { %v661_v23 = vadd.f32 %v660_v21, %v659_v22 }
 0x115   : > { %662 = vadd.xlane.f32.xlu0 %v661_v23 }
 0x1a2   : > { %v663_v55 = vpop.xlane.xlu0 %662 }
 0x1a3   : > { %v665_v58 = vmul.f32 0.027027028, %v663_v55 }
 0x1a5   : > { %667 = vst [vmem:[%s281_s23] sm:$0x1] %v665_v58 }
 0x1a6   : > { %1051 = shalt.err (!%p1048_p7)
}
 0x1a7   : > { %s1052_s11 = scalar_lea.hbm %s1494_s10, 16  ;;  %s1056_s29 = scalar_lea.hbm %s1548_s3, 32 }
 0x1a8   : > { %p1053_p3 = scmp.ne.s32.totalorder %s1494_s10, %s1052_s11  ;;  %p1057_p2 = scmp.lt.u32.totalorder %s1494_s10, %s1548_s3 }
 0x1a9   : > { %p1058_p0 = scmp.lt.u32.totalorder %s1056_s29, %s1052_s11  ;;  %p1060_p8 = scmp.lt.u32.totalorder %s1052_s11, %s1494_s10 }
 0x1aa   : > { %p1054_p5 = pnand %p1053_p3, %p1575_p9 }
 0x1ab   : > { %p1059_p6 = por %p1058_p0, %p1057_p2 }
 0x1ac   : > { %p1055_p1 = pneg %p1054_p5 }
 0x1ad   : > { %p1061_p12 = por %p1060_p8, %p1059_p6 }
 0x1af   : > { %p1062_p4 = pnand %p1061_p12, %p1055_p1 }
 0x1b1   : > { %1065 = shalt.err (!%p1062_p4)
}
 0x1b2   : > { %836 = dma.vmem_to_hbm [thread:$0]  (%p1575_p9), %s1496_s7, 16, %s1494_s10, %s669_s9  }
 0x1b3 PF: > { %s693_s22 = sand.u32 1, %s1104_s12   ;;  %p1576_p10 = scmp.ne.s32.totalorder %s1563_s27, 0 }
 0x1b4   : > { %p1577_p13 = scmp.ge.s32.totalorder %s1124_s17, 2  ;;  %s694_s19 = scalar_lea.sflag [#allocation5], %s693_s22 }
 0x1b6   : > { %p849_p11 = pnand %p1577_p13, %p1576_p10 }
 0x1b8   : > { %1099 = dma.done.wait (!%p849_p11), %s694_s19, 16  }
 0x1b9   : > { %1101 = vsyncadd (!%p849_p11), %s694_s19, 4294967280  ;;  %s22_s17 = sadd.s32 1, %s1124_s17   ;;  %s1578_s25 = sld [smem:[#allocation15_spill]] }
 0x1ba   : > { %p19_p7 = scmp.ge.s32.totalorder %s22_s17, 4   ;;  %s1579_s15 = sld [smem:[#allocation13_spill]] }
 0x1bb   : > { %s1580_s16 = sld [smem:[#allocation14_spill]]  ;;  %s1581_s12 = smov %s1108_s13 }
 0x1bc   : > { %s1582_s13 = smov %s1112_s14  ;;  %21 = sbr.rel (!%p19_p7) target bundleno = 11 (0xb), region = 117 }
 0x1bf   : > { %s1583_s14 = smov %s1578_s25 }
 0x1c3   :  { %698 = vsyncpa [#allocation4], 1 }
 0x1c4   :  { %700 = vsyncpa [#allocation4 + $0x1], 1 }
 0x1c5   :  { %701 = vsyncpa [#allocation7], 1 }
 0x1c6   :  { %703 = vsyncpa [#allocation7 + $0x1], 1 }
 0x1c7   :  { %704 = vsyncpa [#allocation5], 1 }
 0x1c8   :  { %706 = vsyncpa [#allocation5 + $0x1], 1 }

</bundles_post_ra>
